<compile_context>
chip_gen: v7x
topology: tpu7x:2x2x1
jax: 0.10.0
libtpu: 0.0.40
codegen_flags: <defaults>
</compile_context>

<pallas_src>
import functools

import jax
import jax.numpy as jnp
from jax import lax
from jax.experimental import pallas as pl
from jax.experimental.pallas import tpu as pltpu


# -----------------------------------------------------------------------------
# Fused kernel: whole DilatedResidualInceptionBlock for one batch element
# -----------------------------------------------------------------------------
def _drib_kernel(x_ref, w1_ref, b1_ref, w2_ref, b2_ref, o_ref, *,
                 L, shifts, neg_slope):
    C, Lp = x_ref.shape[1], x_ref.shape[2]

    def lrelu(v):
        return jnp.where(v >= 0, v, neg_slope * v)

    xc = x_ref[0]                                            # (C, Lp), lane aligned
    lane = lax.broadcasted_iota(jnp.int32, (C, Lp), 1)

    # (1) All four 1x1 conv + BN branches as a single MXU matmul (BN folded
    # into w1 / b1 on the host).
    t = jnp.dot(w1_ref[...], xc, preferred_element_type=jnp.float32) + b1_ref[...]
    a = lrelu(t)
    a = jnp.where(lane < L, a, 0.0)      # zero the lane-rounding pad (t = bias there)

    # (2) Build the stacked operand in registers: one rolled+masked copy of `a`
    # per distinct tap shift (XLU roll + VPU select, no VMEM traffic) plus the
    # raw input block (used for the br4 1x1 fold).  All blocks are C rows, so
    # the sublane concat is vreg-aligned.
    blocks = []
    for s in shifts:
        if s == 0:
            blocks.append(a)
        else:
            rolled = pltpu.roll(a, shift=(-s) % Lp, axis=1)  # rolled[:, j] = a[:, (j+s) % Lp]
            valid = (lane + s >= 0) & (lane + s < L)          # 'same' halo + pad mask
            blocks.append(jnp.where(valid, rolled, 0.0))
    blocks.append(xc)
    stack = jnp.concatenate(blocks, axis=0)                   # ((len(shifts)+1)*C, Lp)

    # Single block-structured matmul for every dilated branch + br4, exact
    # residual add on the VPU, final LeakyReLU, one dense full-slab store.
    pre = jnp.dot(w2_ref[...], stack, preferred_element_type=jnp.float32)
    pre = pre + b2_ref[...] + xc
    o_ref[0] = lrelu(pre).astype(o_ref.dtype)


# -----------------------------------------------------------------------------
# Host wrapper: fold BN, build block-structured weights, launch fused kernel
# -----------------------------------------------------------------------------
def dilated_residual_inception_block(x, params, *, kernel_size=3, eps=1e-5):
    """x: (N, C, L) with C % 4 == 0.  Returns (N, C, L)."""
    N, C, L = x.shape
    assert C % 4 == 0
    oc4 = C // 4
    K = kernel_size
    dils = (8, 4, 2)
    # Distinct tap shifts over all branches: (-8, -4, -2, 0, 2, 4, 8).
    shifts = tuple(sorted({(k - 1) * d for d in dils for k in range(K)}))
    n_blk = len(shifts) + 1                       # + raw-input block

    def fold(p):
        # Conv bias + inference-mode BN folded into the conv weights, so the
        # in-kernel epilogue is just `acc + bias`.
        s = p['gamma'] / jnp.sqrt(p['var'] + eps)
        w = (p['w'] * s[:, None, None]).astype(jnp.float32)
        b = (p['beta'] + s * (p['b'] - p['mean'])).astype(jnp.float32)
        return w, b

    # Stacked, folded 1x1 weights/biases for all four branches: (C, C), (C, 1).
    w1_list, b1_list = [], []
    for name in ('br1_a', 'br2_a', 'br3_a', 'br4'):
        w, b = fold(params[name])
        w1_list.append(w[:, :, 0])
        b1_list.append(b)
    w1 = jnp.concatenate(w1_list, axis=0)
    b1 = jnp.concatenate(b1_list)[:, None]

    # Block-structured second-stage weight (C, n_blk*C): column block `si`
    # multiplies the activation copy shifted by shifts[si]; the last block
    # multiplies the raw input (br4's 1x1).  Bias covers all four branches.
    w2 = jnp.zeros((C, n_blk * C), jnp.float32)
    b2 = jnp.zeros((C,), jnp.float32)
    for i, d in enumerate(dils):
        wd, bd = fold(params[f'br{i + 1}_b'])     # (oc4, oc4, K)
        r0 = i * oc4
        for k in range(K):
            c0 = shifts.index((k - 1) * d) * C + i * oc4
            w2 = w2.at[r0:r0 + oc4, c0:c0 + oc4].set(wd[:, :, k])
        b2 = b2.at[r0:r0 + oc4].set(bd)
    w4, b4 = fold(params['br4'])
    x0 = len(shifts) * C
    w2 = w2.at[3 * oc4:C, x0:x0 + C].set(w4[:, :, 0])
    b2 = b2.at[3 * oc4:C].set(b4)
    b2 = b2[:, None]

    # Lane alignment only (no halo pad): round L up to a multiple of 128.
    # For MXU-bound sizes, cast x_pad / w1 / w2 to bf16 here (f32 accumulate).
    Lp = pl.cdiv(L, 128) * 128
    x_pad = jnp.pad(x, ((0, 0), (0, 0), (0, Lp - L))).astype(jnp.float32)

    kernel = functools.partial(_drib_kernel, L=L, shifts=shifts, neg_slope=0.2)

    # VMEM/step ~ (double-buffered in + out + stack) * 4B ≈ 0.9 KB per lane at
    # C=16 — well under the 32 MiB scoped default up to L ~ 30K.
    # TODO(synk): add a lane-tile grid axis (with tap halo) for very long
    # sequences / v7x's 64 MiB physical VMEM.
    out = pl.pallas_call(
        kernel,
        out_shape=jax.ShapeDtypeStruct((N, C, Lp), x.dtype),
        grid_spec=pltpu.PrefetchScalarGridSpec(
            num_scalar_prefetch=0,
            grid=(N,),
            in_specs=[
                pl.BlockSpec((1, C, Lp), lambda n: (n, 0, 0)),       # x (lane aligned)
                pl.BlockSpec((C, C), lambda n: (0, 0)),              # 1x1 weights
                pl.BlockSpec((C, 1), lambda n: (0, 0)),              # 1x1 biases
                pl.BlockSpec((C, n_blk * C), lambda n: (0, 0)),      # block weight
                pl.BlockSpec((C, 1), lambda n: (0, 0)),              # block biases
            ],
            out_specs=pl.BlockSpec((1, C, Lp), lambda n: (n, 0, 0)),
        ),
        compiler_params=pltpu.CompilerParams(
            dimension_semantics=("parallel",)),   # batch across TCs on v7x
    )(x_pad, w1, b1, w2, b2)
    return out[:, :, :L]


# -----------------------------------------------------------------------------
# Deterministic parameter init (shapes from the module __init__)
# -----------------------------------------------------------------------------
def init_params(key, in_chans=16, kernel_size=3):
    oc4 = in_chans // 4
    keys = iter(jax.random.split(key, 64))

    def conv_bn(c_out, c_in, k):
        return dict(
            w=0.3 * jax.random.normal(next(keys), (c_out, c_in, k), jnp.float32),
            b=0.1 * jax.random.normal(next(keys), (c_out,), jnp.float32),
            gamma=1.0 + 0.1 * jax.random.normal(next(keys), (c_out,), jnp.float32),
            beta=0.1 * jax.random.normal(next(keys), (c_out,), jnp.float32),
            mean=0.1 * jax.random.normal(next(keys), (c_out,), jnp.float32),
            var=1.0 + 0.1 * jnp.abs(jax.random.normal(next(keys), (c_out,),
                                                      jnp.float32)),
        )

    return dict(
        br1_a=conv_bn(oc4, in_chans, 1), br1_b=conv_bn(oc4, oc4, kernel_size),
        br2_a=conv_bn(oc4, in_chans, 1), br2_b=conv_bn(oc4, oc4, kernel_size),
        br3_a=conv_bn(oc4, in_chans, 1), br3_b=conv_bn(oc4, oc4, kernel_size),
        br4=conv_bn(oc4, in_chans, 1),
    )


# -----------------------------------------------------------------------------
# Pure-JAX reference (inference-mode BN), mirrors the PyTorch module
# -----------------------------------------------------------------------------
def _ref_conv_bn(x, p, *, dilation=1, pad=0, eps=1e-5):
    y = lax.conv_general_dilated(
        x, p['w'], (1,), [(pad, pad)], rhs_dilation=(dilation,),
        dimension_numbers=('NCH', 'OIH', 'NCH'),
        precision=lax.Precision.HIGHEST)
    y = y + p['b'][None, :, None]
    return (p['gamma'][None, :, None] * (y - p['mean'][None, :, None])
            / jnp.sqrt(p['var'][None, :, None] + eps) + p['beta'][None, :, None])


def _lrelu(x):
    return jnp.where(x >= 0, x, 0.2 * x)     # module uses LeakyReLU(0.2)


def drib_ref(x, params, *, kernel_size=3):
    xs = []
    for a, b, d in [('br1_a', 'br1_b', 8), ('br2_a', 'br2_b', 4),
                    ('br3_a', 'br3_b', 2)]:
        t = _lrelu(_ref_conv_bn(x, params[a]))
        xs.append(_ref_conv_bn(t, params[b], dilation=d,
                               pad=d * (kernel_size - 1) // 2))
    xs.append(_ref_conv_bn(x, params['br4']))
    return _lrelu(jnp.concatenate(xs, axis=1) + x)


# -----------------------------------------------------------------------------
if __name__ == "__main__":
    key = jax.random.PRNGKey(0)
    kx, kp = jax.random.split(key)

    N, C, L = 2, 16, 128
    x = jax.random.normal(kx, (N, C, L), jnp.float32)
    params = init_params(kp, in_chans=C)

    out = jax.block_until_ready(dilated_residual_inception_block(x, params))
    assert out.shape == (N, C, L), out.shape

    ref = jax.block_until_ready(drib_ref(x, params))
    err = float(jnp.max(jnp.abs(out - ref)))
    assert err < 1e-2, f"max abs err {err}"

    # TODO(synk): BatchNorm is implemented in inference mode (running stats);
    # training-mode batch statistics are not computed in-kernel.
    print("KERNEL_OK")
</pallas_src>

<mosaic_0001>
module attributes {stable_mosaic.version = 11 : i64} {
  func.func @_drib_kernel(%arg0: i32, %arg1: memref<1x16x128xf32, #tpu.memory_space<vmem>>, %arg2: memref<16x16xf32, #tpu.memory_space<vmem>>, %arg3: memref<16x1xf32, #tpu.memory_space<vmem>>, %arg4: memref<16x128xf32, #tpu.memory_space<vmem>>, %arg5: memref<16x1xf32, #tpu.memory_space<vmem>>, %arg6: memref<1x16x128xf32, #tpu.memory_space<vmem>>) attributes {dimension_semantics = [#tpu.dimension_semantics<parallel>], iteration_bounds = array<i64: 2>, scalar_prefetch = 0 : i64, scratch_operands = 0 : i64, tpu.core_type = #tpu.core_type<tc>, window_params = [{transform_indices = @transform_0, window_bounds = array<i64: 1, 16, 128>}, {pipeline_mode = #tpu.pipeline_mode<synchronous>, transform_indices = @transform_1, window_bounds = array<i64: 16, 16>}, {pipeline_mode = #tpu.pipeline_mode<synchronous>, transform_indices = @transform_2, window_bounds = array<i64: 16, 1>}, {pipeline_mode = #tpu.pipeline_mode<synchronous>, transform_indices = @transform_3, window_bounds = array<i64: 16, 128>}, {pipeline_mode = #tpu.pipeline_mode<synchronous>, transform_indices = @transform_4, window_bounds = array<i64: 16, 1>}, {transform_indices = @transform_5, window_bounds = array<i64: 1, 16, 128>}]} {
    %c0 = arith.constant 0 : index
    %c0_0 = arith.constant 0 : index
    %c0_1 = arith.constant 0 : index
    %0 = vector.load %arg1[%c0, %c0_0, %c0_1] : memref<1x16x128xf32, #tpu.memory_space<vmem>>, vector<1x16x128xf32>
    %1 = vector.shape_cast %0 : vector<1x16x128xf32> to vector<16x128xf32>
    %2 = tpu.iota {dimensions = array<i32: 1>} : vector<16x128xi32>
    %c0_2 = arith.constant 0 : index
    %c0_3 = arith.constant 0 : index
    %3 = vector.load %arg2[%c0_2, %c0_3] : memref<16x16xf32, #tpu.memory_space<vmem>>, vector<16x16xf32>
    %cst = arith.constant dense<0.000000e+00> : vector<16x128xf32>
    %4 = tpu.matmul %3, %1, %cst {dimension_numbers = #tpu.dot_dimension_numbers<[1], [0], [0], [1], [0, 0, 1, 1], [], []>} : vector<16x16xf32>, vector<16x128xf32>, vector<16x128xf32> -> vector<16x128xf32>
    %c0_4 = arith.constant 0 : index
    %c0_5 = arith.constant 0 : index
    %5 = vector.load %arg3[%c0_4, %c0_5] : memref<16x1xf32, #tpu.memory_space<vmem>>, vector<16x1xf32>
    %6 = vector.broadcast %5 : vector<16x1xf32> to vector<16x128xf32>
    %7 = arith.addf %4, %6 : vector<16x128xf32>
    %cst_6 = arith.constant 0.000000e+00 : f32
    %8 = vector.broadcast %cst_6 : f32 to vector<16x128xf32>
    %9 = arith.cmpf oge, %7, %8 : vector<16x128xf32>
    %cst_7 = arith.constant 2.000000e-01 : f32
    %10 = vector.broadcast %cst_7 : f32 to vector<16x128xf32>
    %11 = arith.mulf %10, %7 : vector<16x128xf32>
    %12 = arith.select %9, %7, %11 : vector<16x128xi1>, vector<16x128xf32>
    %c128_i32 = arith.constant 128 : i32
    %13 = vector.broadcast %c128_i32 : i32 to vector<16x128xi32>
    %14 = arith.cmpi slt, %2, %13 : vector<16x128xi32>
    %cst_8 = arith.constant 0.000000e+00 : f32
    %15 = vector.broadcast %cst_8 : f32 to vector<16x128xf32>
    %16 = arith.select %14, %12, %15 : vector<16x128xi1>, vector<16x128xf32>
    %c8_i32 = arith.constant 8 : i32
    %17 = tpu.dynamic_rotate %16 by %c8_i32 dim 1 : vector<16x128xf32>, i32 -> vector<16x128xf32>
    %c-8_i32 = arith.constant -8 : i32
    %18 = vector.broadcast %c-8_i32 : i32 to vector<16x128xi32>
    %19 = arith.addi %2, %18 : vector<16x128xi32>
    %c0_i32 = arith.constant 0 : i32
    %20 = vector.broadcast %c0_i32 : i32 to vector<16x128xi32>
    %21 = arith.cmpi sge, %19, %20 : vector<16x128xi32>
    %c-8_i32_9 = arith.constant -8 : i32
    %22 = vector.broadcast %c-8_i32_9 : i32 to vector<16x128xi32>
    %23 = arith.addi %2, %22 : vector<16x128xi32>
    %c128_i32_10 = arith.constant 128 : i32
    %24 = vector.broadcast %c128_i32_10 : i32 to vector<16x128xi32>
    %25 = arith.cmpi slt, %23, %24 : vector<16x128xi32>
    %26 = arith.andi %21, %25 : vector<16x128xi1>
    %cst_11 = arith.constant 0.000000e+00 : f32
    %27 = vector.broadcast %cst_11 : f32 to vector<16x128xf32>
    %28 = arith.select %26, %17, %27 : vector<16x128xi1>, vector<16x128xf32>
    %c4_i32 = arith.constant 4 : i32
    %29 = tpu.dynamic_rotate %16 by %c4_i32 dim 1 : vector<16x128xf32>, i32 -> vector<16x128xf32>
    %c-4_i32 = arith.constant -4 : i32
    %30 = vector.broadcast %c-4_i32 : i32 to vector<16x128xi32>
    %31 = arith.addi %2, %30 : vector<16x128xi32>
    %c0_i32_12 = arith.constant 0 : i32
    %32 = vector.broadcast %c0_i32_12 : i32 to vector<16x128xi32>
    %33 = arith.cmpi sge, %31, %32 : vector<16x128xi32>
    %c-4_i32_13 = arith.constant -4 : i32
    %34 = vector.broadcast %c-4_i32_13 : i32 to vector<16x128xi32>
    %35 = arith.addi %2, %34 : vector<16x128xi32>
    %c128_i32_14 = arith.constant 128 : i32
    %36 = vector.broadcast %c128_i32_14 : i32 to vector<16x128xi32>
    %37 = arith.cmpi slt, %35, %36 : vector<16x128xi32>
    %38 = arith.andi %33, %37 : vector<16x128xi1>
    %cst_15 = arith.constant 0.000000e+00 : f32
    %39 = vector.broadcast %cst_15 : f32 to vector<16x128xf32>
    %40 = arith.select %38, %29, %39 : vector<16x128xi1>, vector<16x128xf32>
    %c2_i32 = arith.constant 2 : i32
    %41 = tpu.dynamic_rotate %16 by %c2_i32 dim 1 : vector<16x128xf32>, i32 -> vector<16x128xf32>
    %c-2_i32 = arith.constant -2 : i32
    %42 = vector.broadcast %c-2_i32 : i32 to vector<16x128xi32>
    %43 = arith.addi %2, %42 : vector<16x128xi32>
    %c0_i32_16 = arith.constant 0 : i32
    %44 = vector.broadcast %c0_i32_16 : i32 to vector<16x128xi32>
    %45 = arith.cmpi sge, %43, %44 : vector<16x128xi32>
    %c-2_i32_17 = arith.constant -2 : i32
    %46 = vector.broadcast %c-2_i32_17 : i32 to vector<16x128xi32>
    %47 = arith.addi %2, %46 : vector<16x128xi32>
    %c128_i32_18 = arith.constant 128 : i32
    %48 = vector.broadcast %c128_i32_18 : i32 to vector<16x128xi32>
    %49 = arith.cmpi slt, %47, %48 : vector<16x128xi32>
    %50 = arith.andi %45, %49 : vector<16x128xi1>
    %cst_19 = arith.constant 0.000000e+00 : f32
    %51 = vector.broadcast %cst_19 : f32 to vector<16x128xf32>
    %52 = arith.select %50, %41, %51 : vector<16x128xi1>, vector<16x128xf32>
    %c126_i32 = arith.constant 126 : i32
    %53 = tpu.dynamic_rotate %16 by %c126_i32 dim 1 : vector<16x128xf32>, i32 -> vector<16x128xf32>
    %c2_i32_20 = arith.constant 2 : i32
    %54 = vector.broadcast %c2_i32_20 : i32 to vector<16x128xi32>
    %55 = arith.addi %2, %54 : vector<16x128xi32>
    %c0_i32_21 = arith.constant 0 : i32
    %56 = vector.broadcast %c0_i32_21 : i32 to vector<16x128xi32>
    %57 = arith.cmpi sge, %55, %56 : vector<16x128xi32>
    %c2_i32_22 = arith.constant 2 : i32
    %58 = vector.broadcast %c2_i32_22 : i32 to vector<16x128xi32>
    %59 = arith.addi %2, %58 : vector<16x128xi32>
    %c128_i32_23 = arith.constant 128 : i32
    %60 = vector.broadcast %c128_i32_23 : i32 to vector<16x128xi32>
    %61 = arith.cmpi slt, %59, %60 : vector<16x128xi32>
    %62 = arith.andi %57, %61 : vector<16x128xi1>
    %cst_24 = arith.constant 0.000000e+00 : f32
    %63 = vector.broadcast %cst_24 : f32 to vector<16x128xf32>
    %64 = arith.select %62, %53, %63 : vector<16x128xi1>, vector<16x128xf32>
    %c124_i32 = arith.constant 124 : i32
    %65 = tpu.dynamic_rotate %16 by %c124_i32 dim 1 : vector<16x128xf32>, i32 -> vector<16x128xf32>
    %c4_i32_25 = arith.constant 4 : i32
    %66 = vector.broadcast %c4_i32_25 : i32 to vector<16x128xi32>
    %67 = arith.addi %2, %66 : vector<16x128xi32>
    %c0_i32_26 = arith.constant 0 : i32
    %68 = vector.broadcast %c0_i32_26 : i32 to vector<16x128xi32>
    %69 = arith.cmpi sge, %67, %68 : vector<16x128xi32>
    %c4_i32_27 = arith.constant 4 : i32
    %70 = vector.broadcast %c4_i32_27 : i32 to vector<16x128xi32>
    %71 = arith.addi %2, %70 : vector<16x128xi32>
    %c128_i32_28 = arith.constant 128 : i32
    %72 = vector.broadcast %c128_i32_28 : i32 to vector<16x128xi32>
    %73 = arith.cmpi slt, %71, %72 : vector<16x128xi32>
    %74 = arith.andi %69, %73 : vector<16x128xi1>
    %cst_29 = arith.constant 0.000000e+00 : f32
    %75 = vector.broadcast %cst_29 : f32 to vector<16x128xf32>
    %76 = arith.select %74, %65, %75 : vector<16x128xi1>, vector<16x128xf32>
    %c120_i32 = arith.constant 120 : i32
    %77 = tpu.dynamic_rotate %16 by %c120_i32 dim 1 : vector<16x128xf32>, i32 -> vector<16x128xf32>
    %c8_i32_30 = arith.constant 8 : i32
    %78 = vector.broadcast %c8_i32_30 : i32 to vector<16x128xi32>
    %79 = arith.addi %2, %78 : vector<16x128xi32>
    %c0_i32_31 = arith.constant 0 : i32
    %80 = vector.broadcast %c0_i32_31 : i32 to vector<16x128xi32>
    %81 = arith.cmpi sge, %79, %80 : vector<16x128xi32>
    %c8_i32_32 = arith.constant 8 : i32
    %82 = vector.broadcast %c8_i32_32 : i32 to vector<16x128xi32>
    %83 = arith.addi %2, %82 : vector<16x128xi32>
    %c128_i32_33 = arith.constant 128 : i32
    %84 = vector.broadcast %c128_i32_33 : i32 to vector<16x128xi32>
    %85 = arith.cmpi slt, %83, %84 : vector<16x128xi32>
    %86 = arith.andi %81, %85 : vector<16x128xi1>
    %cst_34 = arith.constant 0.000000e+00 : f32
    %87 = vector.broadcast %cst_34 : f32 to vector<16x128xf32>
    %88 = arith.select %86, %77, %87 : vector<16x128xi1>, vector<16x128xf32>
    %89 = tpu.concatenate %28, %40, %52, %16, %64, %76, %88, %1 in 0 : vector<16x128xf32>, vector<16x128xf32>, vector<16x128xf32>, vector<16x128xf32>, vector<16x128xf32>, vector<16x128xf32>, vector<16x128xf32>, vector<16x128xf32> -> vector<128x128xf32>
    %c0_35 = arith.constant 0 : index
    %c0_36 = arith.constant 0 : index
    %90 = vector.load %arg4[%c0_35, %c0_36] : memref<16x128xf32, #tpu.memory_space<vmem>>, vector<16x128xf32>
    %cst_37 = arith.constant dense<0.000000e+00> : vector<16x128xf32>
    %91 = tpu.matmul %90, %89, %cst_37 {dimension_numbers = #tpu.dot_dimension_numbers<[1], [0], [0], [1], [0, 0, 1, 1], [], []>} : vector<16x128xf32>, vector<128x128xf32>, vector<16x128xf32> -> vector<16x128xf32>
    %c0_38 = arith.constant 0 : index
    %c0_39 = arith.constant 0 : index
    %92 = vector.load %arg5[%c0_38, %c0_39] : memref<16x1xf32, #tpu.memory_space<vmem>>, vector<16x1xf32>
    %93 = vector.broadcast %92 : vector<16x1xf32> to vector<16x128xf32>
    %94 = arith.addf %91, %93 : vector<16x128xf32>
    %95 = arith.addf %94, %1 : vector<16x128xf32>
    %cst_40 = arith.constant 0.000000e+00 : f32
    %96 = vector.broadcast %cst_40 : f32 to vector<16x128xf32>
    %97 = arith.cmpf oge, %95, %96 : vector<16x128xf32>
    %cst_41 = arith.constant 2.000000e-01 : f32
    %98 = vector.broadcast %cst_41 : f32 to vector<16x128xf32>
    %99 = arith.mulf %98, %95 : vector<16x128xf32>
    %100 = arith.select %97, %95, %99 : vector<16x128xi1>, vector<16x128xf32>
    %c0_42 = arith.constant 0 : index
    %c0_43 = arith.constant 0 : index
    %c0_44 = arith.constant 0 : index
    %101 = vector.load %arg6[%c0_42, %c0_43, %c0_44] : memref<1x16x128xf32, #tpu.memory_space<vmem>>, vector<1x16x128xf32>
    %102 = vector.shape_cast %101 : vector<1x16x128xf32> to vector<16x128xf32>
    %103 = vector.shape_cast %100 : vector<16x128xf32> to vector<1x16x128xf32>
    tpu.vector_store %arg6[%c0_42, %c0_43, %c0_44], %103 {strides = array<i32>} : memref<1x16x128xf32, #tpu.memory_space<vmem>>, vector<1x16x128xf32>,
    return
  }
  func.func @transform_0(%arg0: i32) -> (i32, i32, i32) {
    %c0_i32 = arith.constant 0 : i32
    %c0_i32_0 = arith.constant 0 : i32
    %c0_i32_1 = arith.constant 0 : i32
    return %arg0, %c0_i32, %c0_i32_0 : i32, i32, i32
  }
  func.func @transform_1(%arg0: i32) -> (i32, i32) {
    %c0_i32 = arith.constant 0 : i32
    %c0_i32_0 = arith.constant 0 : i32
    %c0_i32_1 = arith.constant 0 : i32
    return %c0_i32, %c0_i32_0 : i32, i32
  }
  func.func @transform_2(%arg0: i32) -> (i32, i32) {
    %c0_i32 = arith.constant 0 : i32
    %c0_i32_0 = arith.constant 0 : i32
    %c0_i32_1 = arith.constant 0 : i32
    return %c0_i32, %c0_i32_0 : i32, i32
  }
  func.func @transform_3(%arg0: i32) -> (i32, i32) {
    %c0_i32 = arith.constant 0 : i32
    %c0_i32_0 = arith.constant 0 : i32
    %c0_i32_1 = arith.constant 0 : i32
    return %c0_i32, %c0_i32_0 : i32, i32
  }
  func.func @transform_4(%arg0: i32) -> (i32, i32) {
    %c0_i32 = arith.constant 0 : i32
    %c0_i32_0 = arith.constant 0 : i32
    %c0_i32_1 = arith.constant 0 : i32
    return %c0_i32, %c0_i32_0 : i32, i32
  }
  func.func @transform_5(%arg0: i32) -> (i32, i32, i32) {
    %c0_i32 = arith.constant 0 : i32
    %c0_i32_0 = arith.constant 0 : i32
    %c0_i32_1 = arith.constant 0 : i32
    return %arg0, %c0_i32, %c0_i32_0 : i32, i32, i32
  }
}

</mosaic_0001>

<bundles_post_ra>
// kernel: tpu_custom_call.1
= control target key start
LH: loop header
LB: loop body
LE: loop exit
PB: predicated region body
PF: predicated region fallthrough
CT: control target
= control target key end

     0   :  { %10 = vsyncpa [#allocation3], 0  ;;  %s1239_s0 = inlined_call_operand.vmem [shape: f32[2,16,128], index: 0, kind: input, shape index: {}]   ;;  %s1240_s1 = inlined_call_operand.hbm [shape: f32[16,16], index: 1, kind: input, shape index: {}]   ;;  %s1241_s2 = inlined_call_operand.vmem [shape: f32[16,1], index: 2, kind: input, shape index: {}]   ;;  %s1242_s3 = inlined_call_operand.hbm [shape: f32[16,128], index: 3, kind: input, shape index: {}]   ;;  %s1243_s4 = inlined_call_operand.vmem [shape: f32[16,1], index: 4, kind: input, shape index: {}]   ;;  %s1244_s5 = inlined_call_operand.hbm [shape: f32[2,16,128], index: 5, kind: output, shape index: {}]  }
   0x1   :  { %11 = vsyncpa [#allocation6], 0 }
   0x2   :  { %12 = vsyncpa [#allocation4], 0 }
   0x3   :  { %14 = vsyncpa [#allocation4 + $0x1], 0  ;;  %s1036_s18 = smov 0   ;;  %s1038_s19 = smov 0  }
   0x4   :  { %s1040_s20 = smov 0   ;;  %s1042_s21 = smov 0  }
   0x5 LB: > { %s1057_s22 = sadd.s32 4294967295, %s991_s21   ;;  %s619_s23 = sadd.s32 4294967294, %s991_s21   ;;  %s991_s21 = sphi %s1042_s21, %s1262_s21   ;;  %s987_s20 = sphi %s1040_s20, %s1261_s20   ;;  %s983_s19 = sphi %s1038_s19, %s1260_s19   ;;  %s979_s18 = sphi %s1036_s18, %s1259_s18  }
   0x6   : > { %s1061_s24 = sadd.s32 1, %s991_s21   ;;  %s137_s25 = sadd.s32 1, %s987_s20 }
   0x7   : > { %s134_s26 = ssub.s32 %s991_s21, %s1061_s24  ;;  %p147_p0 = scmp.ne.s32.totalorder %s987_s20, %s983_s19 }
   0x8   : > { %p135_p1 = scmp.eq.s32.totalorder %s134_s26, 0  ;;  %p148_p2 = scmp.eq.s32.totalorder %s1057_s22, 1 }
   0x9   : > { %p153_p3 = scmp.ne.s32.totalorder %s983_s19, %s979_s18  ;;  %p154_p4 = scmp.eq.s32.totalorder %s619_s23, 1 }
   0xa   : > { %s1072_s27 = scalar_select %p135_p1, %s987_s20, %s137_s25  }
   0xb   : > { %p1074_p5 = por %p148_p2, %p147_p0  ;;  %p1078_p6 = por %p154_p4, %p153_p3 }
   0xc   : > { %p620_p7 = scmp.ge.s32.totalorder %s991_s21, 1  ;;  %p161_p8 = scmp.lt.s32.totalorder %s991_s21, 3 }
   0xd   : > { %s1248_s28 = scalar_select %p1074_p5, 1, 0 }
   0xe   : > { %s1249_s29 = scalar_select %p1078_p6, 1, 0 }
   0xf   : > { %p1245_p9 = scmp.eq.s32.totalorder %s1057_s22, 0  ;;  %p1085_p10 = pnand %p620_p7, %p161_p8 }
  0x10   : > { %s993_s6 = smov [#allocation2]   ;;  %s994_s9 = smov [#allocation5]  }
  0x11   : > { %s1250_s30 = scalar_select %p1085_p10, 1, 0 }
  0x12   : > { %s173_s7 = sshll.u32 %s993_s6, 4  ;;  %p773_p11 = pneg %p1085_p10  ;;  %s174_s7 = int_to_ptr.vmem [resolvable:$true] %s173_s7 }
  0x13   : > { %s189_s10 = sshll.u32 %s994_s9, 4  ;;  %s865_s13 = scalar_lea.hbm %s1240_s1, 256  ;;  %s1097_s10 = int_to_ptr.vmem [resolvable:$true] %s189_s10 }
  0x14   : > { %p1093_p12 = pnand %p1245_p9, %p773_p11  ;;  %p866_p13 = scmp.ne.s32.totalorder %s1240_s1, %s865_s13 }
  0x15   : > { %p872_p3 = scmp.lt.u32.totalorder %s865_s13, %s1240_s1 }
  0x16   : > { %p867_p0 = pneg %p1093_p12 }
  0x18   : > { %p868_p1 = pnand %p867_p0, %p866_p13 }
  0x1a   : > { %p869_p2 = pneg %p868_p1 }
  0x1c   : > { %p874_p4 = pnand %p872_p3, %p869_p2 }
  0x1e   : > { %877 = shalt.err (!%p874_p4)
}
  0x1f   : > { %s878_s23 = scalar_lea.vmem %s174_s7, 256  ;;  %p886_p9 = scmp.lt.s32.totalorder %s174_s7, %s174_s7 }
  0x20   : > { %p879_p7 = scmp.ne.s32.totalorder %s174_s7, %s878_s23  ;;  %p887_p6 = scmp.lt.s32.totalorder %s878_s23, %s878_s23 }
  0x22   : > { %p881_p8 = pnand %p879_p7, %p867_p0  ;;  %p888_p5 = por %p887_p6, %p886_p9 }
  0x24   : > { %p882_p11 = pneg %p881_p8 }
  0x26   : > { %p889_p10 = pnand %p888_p5, %p882_p11 }
  0x28   : > { %892 = shalt.err (!%p889_p10)
}
  0x29   : > { %s995_s25 = smov 128   ;;  %s996_s26 = smov 8  }
  0x2a   : > { %776 = dma.hbm_to_vmem [thread:$0]  (!%p1093_p12), %s1240_s1, 256, %s174_s7, [#allocation3], %s995_s25, %s995_s25, %s996_s26  }
  0x2b   : > { %s893_s13 = scalar_lea.hbm %s1242_s3, 256 }
  0x2c   : > { %p894_p13 = scmp.ne.s32.totalorder %s1242_s3, %s893_s13  ;;  %p900_p9 = scmp.lt.u32.totalorder %s893_s13, %s1242_s3 }
  0x2e   : > { %p896_p5 = pnand %p894_p13, %p867_p0 }
  0x30   : > { %p897_p6 = pneg %p896_p5 }
  0x32   : > { %p902_p10 = pnand %p900_p9, %p897_p6 }
  0x34   : > { %905 = shalt.err (!%p902_p10)
}
  0x35   : > { %s906_s7 = scalar_lea.vmem %s1097_s10, 256  ;;  %p914_p4 = scmp.lt.s32.totalorder %s1097_s10, %s1097_s10 }
  0x36   : > { %p907_p1 = scmp.ne.s32.totalorder %s1097_s10, %s906_s7  ;;  %p915_p7 = scmp.lt.s32.totalorder %s906_s7, %s906_s7 }
  0x38   : > { %p909_p2 = pnand %p907_p1, %p867_p0  ;;  %p916_p8 = por %p915_p7, %p914_p4 }
  0x3a   : > { %p910_p3 = pneg %p909_p2 }
  0x3c   : > { %p917_p11 = pnand %p916_p8, %p910_p3 }
  0x3e   : > { %920 = shalt.err (!%p917_p11)
}
  0x3f   : > { %779 = dma.hbm_to_vmem [thread:$0]  (!%p1093_p12), %s1242_s3, 256, %s1097_s10, [#allocation6], %s995_s25, %s995_s25, %s996_s26  }
  0x40   : > { %p1252_p13 = scmp.ne.s32.totalorder %s1250_s30, 0 }
  0x41   : > { %p1253_p5 = scmp.eq.s32.totalorder (!%p1252_p13), %s1057_s22, 0 }
  0x42   : > { %216 = sbr.rel (%p1252_p13) target bundleno = 697 (0x2b9), region = 40 }
  0x49   : > { %966 = dma.done.wait (%p1253_p5), [#allocation3], 256   ;;  %p1254_p0 = pmov %p1253_p5 }
  0x4b   : > { %968 = vsyncadd (%p1254_p0), [#allocation3], 4294967040  ;;  %p1255_p6 = pmov %p1254_p0 }
  0x4c   : > { %p1256_p9 = pmov %p1254_p0 }
  0x4d   : > { %970 = dma.done.wait (%p1255_p6), [#allocation6], 256  }
  0x4e   : > { %972 = vsyncadd (%p1256_p9), [#allocation6], 4294967040  ;;  %p248_p10 = scmp.lt.s32.totalorder %s1057_s22, 1  ;;  %v997_v0 = vmov 0   ;;  %vm271_vm0 = vcmask 130048   ;;  %v257_v3 = vld [vmem:[#allocation2] sm:$0xff]  ;;  %v255_v23 = vlaneseq }
  0x4f   : > { %833 = vset.pattern.permute.xlu0 %v997_v0  ;;  %864 = vset.pattern.permute.xlu1 %v997_v0  ;;  %v259_v5 = vld [vmem:[%s1241_s2] sm:$0xff]  ;;  %v260_v6 = vld [vmem:[%s1241_s2 + $0x8] sm:$0xff]  ;;  %s998_s14 = smov 2   ;;  %s999_s15 = smov 8   ;;  %v422_v21 = vld [vmem:[#allocation5] sm:$0xff] }
  0x50   : > { %s249_s30 = scalar_select %p248_p10, %s1057_s22, 1  ;;  %677 = vmatprep.mubr.msk.f32.mxu0 %vm271_vm0, %v257_v3  ;;  %263 = vperm.xlu0 %833, %v259_v5   ;;  %v258_v7 = vld [vmem:[#allocation2 + $0x8] sm:$0xff]  ;;  %v424_v20 = vld [vmem:[%s1243_s4] sm:$0xff]  ;;  %v256_v24 = vand.u32 127, %v255_v23  ;;  %v423_v55 = vld [vmem:[#allocation5 + $0x8] sm:$0xff] }
  0x51   : > { %s1000_s16 = smov 124   ;;  %s1001_s17 = smov 4   ;;  %712 = vmatprep.mubr.f32.mxu1 %v422_v21  ;;  %v425_v22 = vld [vmem:[%s1243_s4 + $0x8] sm:$0xff] }
  0x52   : > { %s649_s8 = sshll.u32 %s249_s30, 4  ;;  %s1002_s6 = smov 126   ;;  %v366_v25 = vadd.s32 4294967288, %v256_v24  ;;  %v376_v26 = vadd.s32 4294967292, %v256_v24  ;;  %v386_v28 = vadd.s32 4294967294, %v256_v24  ;;  %v396_v40 = vadd.s32 2, %v256_v24 }
  0x53   : > { %s252_s26 = scalar_lea.vmem %s1239_s0, %s649_s8  ;;  %s1003_s30 = smov 120   ;;  %v406_v42 = vadd.s32 4, %v256_v24  ;;  %v416_v49 = vadd.s32 8, %v256_v24 }
  0x54   : > { %v1161_v1 = vld [vmem:[%s252_s26] sm:$0xff]  ;;  %v1163_v2 = vld [vmem:[%s252_s26 + $0x8] sm:$0xff]  ;;  %268 = vperm.xlu0 %833, %v260_v6   ;;  %vm367_vm3 = vcmp.ge.s32.totalorder %v366_v25, 0  ;;  %vm377_vm5 = vcmp.ge.s32.totalorder %v376_v26, 0  ;;  %vm387_vm6 = vcmp.ge.s32.totalorder %v386_v28, 0  ;;  %vm398_vm9 = vcmp.lt.s32.totalorder %v396_v40, 128 }
  0x55   : > { %v1167_v4 = vpack.c.bf16 %v1163_v2, %v1161_v1  ;;  %vm720_vm4 = vmpackc.low %vm367_vm3, %vm367_vm3  ;;  %vm408_vm11 = vcmp.lt.s32.totalorder %v406_v42, 128  ;;  %vm418_vm13 = vcmp.lt.s32.totalorder %v416_v49, 128  ;;  %s245_s25 = sand.u32 1, %s983_s19   ;;  %s650_s12 = sshll.u32 %s1057_s22, 8 }
  0x56   : > { %vm726_vm7 = vmpackc.low %vm377_vm5, %vm377_vm5  ;;  %s627_s26 = sshll.u32 %s245_s25, 4  ;;  %p1257_p1 = scmp.ne.s32.totalorder %s1248_s28, 0 }
  0x57   : > { %716 = vmatprep.subr.bf16.mxu0 %v1167_v4  ;;  %vm732_vm8 = vmpackc.low %vm387_vm6, %vm387_vm6  ;;  %s247_s9 = scalar_lea.vmem [#allocation7], %s627_s26  ;;  %s1004_s7 = smov [#allocation7]  }
  0x58   : > { %718 = vmatpush3.bf16.msra.mxu0 %v1167_v4  ;;  %vm742_vm10 = vmpackc.low %vm398_vm9, %vm398_vm9  ;;  %s535_s11 = sshll.u32 %s247_s9, 4  ;;  %s925_s23 = sshll.u32 %s1004_s7, 4  ;;  %s1190_s11 = int_to_ptr.vmem [resolvable:$true] %s535_s11  ;;  %s926_s23 = int_to_ptr.vmem [resolvable:$false] %s925_s23 }
  0x59   : > { %vm748_vm12 = vmpackc.low %vm408_vm11, %vm408_vm11  ;;  %s921_s22 = scalar_lea.vmem %s1190_s11, 256  ;;  %p928_p4 = scmp.lt.s32.totalorder %s1190_s11, %s926_s23 }
  0x5a   : > { %vm754_vm14 = vmpackc.low %vm418_vm13, %vm418_vm13  ;;  %p922_p12 = scmp.ne.s32.totalorder %s1190_s11, %s921_s22 }
  0x5b   : > { %678 = vmatmul.mubr.msk.f32.vlgmr.msra.gmra.mrb[0].mxu0 %vm271_vm0, %v258_v7 }
  0x5c   : > { %p923_p2 = pnand %p922_p12, %p1257_p1 }
  0x5e   : > { %p924_p3 = pneg %p923_p2 }
  0xcf   : > { %v264_v8 = vpop.permute.xlu0 %263 }
  0xd3   : > { %v269_v9 = vpop.permute.xlu0 %268 }
 0x12e   : > { %v679_v10 = vpop.f32.mrb[0].mxu0 }
 0x12f   : > { %v350_v11 = vadd.f32 %v679_v10, %v269_v9  ;;  %v344_v12 = vpop.f32.mrb[1].mxu0 }
 0x130   : > { %v345_v13 = vadd.f32 %v344_v12, %v264_v8 }
 0x131   : > { %vm354_vm1 = vcmp.ge.f32.partialorder %v350_v11, 0.0  ;;  %v356_v14 = vmul.f32 0.2, %v350_v11 }
 0x132   : > { %vm353_vm2 = vcmp.ge.f32.partialorder %v345_v13, 0.0  ;;  %v355_v15 = vmul.f32 0.2, %v345_v13 }
 0x133   : > { %v358_v16 = vsel %vm354_vm1, %v350_v11, %v356_v14 }
 0x134   : > { %v357_v17 = vsel %vm353_vm2, %v345_v13, %v355_v15 }
 0x135   : > { %v844_v18 = vpack.i.bf16 %v358_v16, %v357_v17  ;;  %v737_v19 = vpack.c.bf16 %v358_v16, %v357_v17 }
 0x137   : > { %845 = vrot.lane.b32.xlu0 %v844_v18, %s998_s14  ;;  %835 = vrot.lane.b32.xlu1 %v844_v18, %s999_s15 }
 0x13b   : > { %855 = vrot.lane.b32.xlu0 %v844_v18, %s1000_s16  ;;  %840 = vrot.lane.b32.xlu1 %v844_v18, %s1001_s17  ;;  %s1195_s16 = scalar_lea.hbm %s1244_s5, %s650_s12  ;;  %s1197_s17 = scalar_lea.sflag [#allocation4], %s245_s25 }
 0x13f   : > { %428 = vperm.xlu0 %833, %v424_v20   ;;  %850 = vrot.lane.b32.xlu1 %v844_v18, %s1002_s6  ;;  %s927_s6 = scalar_lea.vmem %s926_s23, 512 }
 0x140   : > { %p929_p7 = scmp.lt.s32.totalorder %s927_s6, %s921_s22 }
 0x142   : > { %p930_p8 = por %p929_p7, %p928_p4 }
 0x143   : > { %860 = vrot.lane.b32.xlu1 %v844_v18, %s1003_s30 }
 0x144   : > { %p931_p11 = pnand %p930_p8, %p924_p3 }
 0x147   : > { %433 = vperm.xlu1 %864, %v425_v22  }
 0x1a9   : > { %v836_v27 = vpop.permute.xlu1 %835  ;;  %v846_v31 = vpop.permute.xlu0 %845 }
 0x1aa   : > { %v838_v29 = vunpack.i.h.bf16 %v836_v27  ;;  %v837_v30 = vunpack.i.l.bf16 %v836_v27  ;;  %v848_v34 = vunpack.i.h.bf16 %v846_v31  ;;  %v847_v35 = vunpack.i.l.bf16 %v846_v31 }
 0x1ac   : > { %v719_v32 = vpack.c.bf16 %v838_v29, %v837_v30  ;;  %v731_v39 = vpack.c.bf16 %v848_v34, %v847_v35 }
 0x1ad   : > { %v841_v33 = vpop.permute.xlu1 %840  ;;  %v856_v45 = vpop.permute.xlu0 %855 }
 0x1ae   : > { %v843_v36 = vunpack.i.h.bf16 %v841_v33  ;;  %v842_v37 = vunpack.i.l.bf16 %v841_v33  ;;  %721 = vmatprep.subr.msk.bf16.mxu1 %vm720_vm4, %v719_v32  ;;  %v858_v46 = vunpack.i.h.bf16 %v856_v45  ;;  %v857_v47 = vunpack.i.l.bf16 %v856_v45 }
 0x1af   : > { %724 = vmatpush3.bf16.msk.msra.mxu1 %vm720_vm4, %v719_v32 }
 0x1b0   : > { %v725_v38 = vpack.c.bf16 %v843_v36, %v842_v37  ;;  %v747_v51 = vpack.c.bf16 %v858_v46, %v857_v47 }
 0x1b1   : > { %v851_v41 = vpop.permute.xlu1 %850 }
 0x1b2   : > { %727 = vmatprep.subr.msk.bf16.mxu1 %vm726_vm7, %v725_v38  ;;  %v853_v43 = vunpack.i.h.bf16 %v851_v41  ;;  %v852_v44 = vunpack.i.l.bf16 %v851_v41 }
 0x1b3   : > { %730 = vmatpush3.bf16.msk.msra.mxu1 %vm726_vm7, %v725_v38 }
 0x1b4   : > { %733 = vmatprep.subr.msk.bf16.mxu1 %vm732_vm8, %v731_v39  ;;  %v741_v48 = vpack.c.bf16 %v853_v43, %v852_v44 }
 0x1b5   : > { %v861_v50 = vpop.permute.xlu1 %860 }
 0x1b6   : > { %v863_v52 = vunpack.i.h.bf16 %v861_v50  ;;  %v862_v53 = vunpack.i.l.bf16 %v861_v50 }
 0x1b7   : > { %736 = vmatpush3.bf16.msk.msra.mxu1 %vm732_vm8, %v731_v39 }
 0x1b8   : > { %738 = vmatprep.subr.bf16.mxu1 %v737_v19  ;;  %v753_v54 = vpack.c.bf16 %v863_v52, %v862_v53 }
 0x1bb   : > { %740 = vmatpush3.bf16.msra.mxu1 %v737_v19 }
 0x1bc   : > { %743 = vmatprep.subr.msk.bf16.mxu1 %vm742_vm10, %v741_v48 }
 0x1be   : > { %v429_v58 = vpop.permute.xlu0 %428 }
 0x1bf   : > { %746 = vmatpush3.bf16.msk.msra.mxu1 %vm742_vm10, %v741_v48 }
 0x1c0   : > { %749 = vmatprep.subr.msk.bf16.mxu1 %vm748_vm12, %v747_v51 }
 0x1c3   : > { %752 = vmatpush3.bf16.msk.msra.mxu1 %vm748_vm12, %v747_v51 }
 0x1c4   : > { %755 = vmatprep.subr.msk.bf16.mxu1 %vm754_vm14, %v753_v54 }
 0x1c6   : > { %v434_v56 = vpop.permute.xlu1 %433 }
 0x1c7   : > { %758 = vmatpush3.bf16.msk.msra.mxu1 %vm754_vm14, %v753_v54 }
 0x1c8   : > { %760 = vmatprep.subr.bf16.mxu1 %v1167_v4 }
 0x1cb   : > { %762 = vmatpush3.bf16.msra.mxu1 %v1167_v4 }
 0x1ce   : > { %713 = vmatmul.mubr.f32.vlgmr.msra.gmra.mrb[0].mxu1 %v423_v55 }
 0x2a1   : > { %v714_v57 = vpop.f32.mrb[0].mxu1 }
 0x2a2   : > { %v508_v59 = vadd.f32 %v714_v57, %v434_v56  ;;  %v502_v60 = vpop.f32.mrb[1].mxu1 }
 0x2a3   : > { %v503_v61 = vadd.f32 %v502_v60, %v429_v58 }
 0x2a4   : > { %v512_v62 = vadd.f32 %v508_v59, %v1163_v2 }
 0x2a5   : > { %v511_v63 = vadd.f32 %v503_v61, %v1161_v1 }
 0x2a6   : > { %vm514_vm15 = vcmp.ge.f32.partialorder %v512_v62, 0.0  ;;  %v516_v0 = vmul.f32 0.2, %v512_v62 }
 0x2a7   : > { %vm513_vm0 = vcmp.ge.f32.partialorder %v511_v63, 0.0  ;;  %v515_v3 = vmul.f32 0.2, %v511_v63 }
 0x2a8   : > { %v518_v4 = vsel %vm514_vm15, %v512_v62, %v516_v0 }
 0x2a9   : > { %520 = vst [vmem:[%s247_s9 + $0x8] sm:$0xff] %v518_v4  ;;  %v517_v2 = vsel %vm513_vm0, %v511_v63, %v515_v3 }
 0x2aa   : > { %519 = vst [vmem:[%s247_s9] sm:$0xff] %v517_v2 }
 0x2ab   : > { %934 = shalt.err (!%p931_p11)
}
 0x2ac   : > { %s935_s30 = scalar_lea.hbm %s1195_s16, 256  ;;  %s939_s25 = scalar_lea.hbm %s1244_s5, 512 }
 0x2ad   : > { %p936_p13 = scmp.ne.s32.totalorder %s1195_s16, %s935_s30  ;;  %p940_p6 = scmp.lt.u32.totalorder %s1195_s16, %s1244_s5 }
 0x2ae   : > { %p941_p9 = scmp.lt.u32.totalorder %s939_s25, %s935_s30  ;;  %p943_p12 = scmp.lt.u32.totalorder %s935_s30, %s1195_s16 }
 0x2af   : > { %p937_p5 = pnand %p936_p13, %p1257_p1 }
 0x2b0   : > { %p942_p10 = por %p941_p9, %p940_p6 }
 0x2b1   : > { %p938_p0 = pneg %p937_p5 }
 0x2b2   : > { %p944_p2 = por %p943_p12, %p942_p10 }
 0x2b4   : > { %p945_p3 = pnand %p944_p2, %p938_p0 }
 0x2b6   : > { %948 = shalt.err (!%p945_p3)
}
 0x2b7   : > { %s1005_s12 = smov 128  }
 0x2b8   : > { %771 = dma.vmem_to_hbm [thread:$0]  (%p1257_p1), %s1190_s11, 256, %s1195_s16, %s1197_s17, %s1005_s12, %s1005_s12, %s999_s15  }
 0x2b9 PF: > { %p788_p4 = scmp.ge.s32.totalorder %s991_s21, 2  ;;  %s550_s13 = sand.u32 1, %s979_s18  }
 0x2ba   : > { %p1258_p7 = scmp.ne.s32.totalorder %s1249_s29, 0  ;;  %s551_s14 = scalar_lea.sflag [#allocation4], %s550_s13 }
 0x2bc   : > { %p781_p8 = pnand %p788_p4, %p1258_p7 }
 0x2be   : > { %974 = dma.done.wait (!%p781_p8), %s551_s14, 256  }
 0x2bf   : > { %976 = vsyncadd (!%p781_p8), %s551_s14, 4294967040  ;;  %p17_p11 = scmp.ge.s32.totalorder %s1061_s24, 4   ;;  %s1259_s18 = smov %s983_s19 }
 0x2c0   : > { %s1260_s19 = smov %s987_s20  ;;  %s1261_s20 = smov %s1072_s27 }
 0x2c1   : > { %s1262_s21 = smov %s1061_s24  ;;  %19 = sbr.rel (!%p17_p11) target bundleno = 5 (0x5), region = 84 }
 0x2c8   :  { %556 = vsyncpa [#allocation3], 1 }
 0x2c9   :  { %558 = vsyncpa [#allocation3 + $0x1], 1 }
 0x2ca   :  { %559 = vsyncpa [#allocation6], 1 }
 0x2cb   :  { %560 = vsyncpa [#allocation4], 1 }
 0x2cc   :  { %562 = vsyncpa [#allocation4 + $0x1], 1 }

</bundles_post_ra>
